<compile_context>
chip_gen: v7x
topology: tpu7x:2x2x1
jax: 0.10.0
libtpu: 0.0.40
codegen_flags: <defaults>
</compile_context>

<pallas_src>
import functools

import jax
import jax.numpy as jnp
from jax.experimental import pallas as pl
from jax.experimental.pallas import tpu as pltpu


def _round_up(x, n):
    return (x + n - 1) // n * n


def classifier1_kernel(
    x_ref,       # (TB, inputSize) f32   (cast to bf16 in-kernel, right before the MXU)
    w1t_ref,     # (24, inputSize) bf16  rows 0:12 -> mixture branch, 12:24 -> value branch
    b1t_ref,     # (24, 1)  f32
    w2t_ref,     # (2m, 24) bf16         block-diagonal: [w_mix | 0 ; 0 | w]
    b2t_ref,     # (2m, 1)  f32
    yt_ref,      # (1, TB)  f32  out:  y^T
    ymixt_ref,   # (m, TB)  bf16 out:  y_mix^T
    *,
    mixture: int,
):
    x = x_ref[...].astype(jnp.bfloat16)   # in-kernel cast: free VPU work, no extra HBM pass

    # H^T = tanh(W1 @ X^T + b1): contract the feature dim of both operands
    # (same dimension_numbers pattern as flash-attention's q @ k^T, so X^T is never
    # materialized).
    ht = jnp.tanh(
        jax.lax.dot_general(
            w1t_ref[...], x,
            dimension_numbers=(((1,), (1,)), ((), ())),
            preferred_element_type=jnp.float32,
        )
        + b1t_ref[...]
    )                                            # (24, TB) f32

    # Z^T = W2_blockdiag @ H^T + b2              # (2m, TB) f32
    zt = (
        jnp.dot(w2t_ref[...], ht.astype(jnp.bfloat16),
                preferred_element_type=jnp.float32)
        + b2t_ref[...]
    )

    # NOTE: `mixture` must be a multiple of 8 so this split is sublane-aligned.
    logits_t = zt[:mixture, :]                   # (m, TB) — mixture branch
    y_all_t = zt[mixture:, :]                    # (m, TB) — value branch

    # softmax over the mixture axis (sublanes); exact divide is free (HBM-bound kernel)
    mx = jnp.max(logits_t, axis=0, keepdims=True)
    e = jnp.exp(logits_t - mx)
    y_mix_t = e / jnp.sum(e, axis=0, keepdims=True)   # (m, TB) f32

    yt_ref[...] = jnp.sum(y_mix_t * y_all_t, axis=0, keepdims=True)  # (1, TB) f32
    ymixt_ref[...] = y_mix_t.astype(ymixt_ref.dtype)                 # (m, TB) bf16


def prepare_params(params):
    """One-time conversion of torch-layout params to the fused bf16 kernel layout."""
    m = params["w_mix"].shape[0]
    # m should be a multiple of 8 (sublane tile) for the in-kernel zt split to be free.
    w1t = jnp.concatenate([params["w_mixpre"], params["w_pre"]], axis=0)   # (24, in)
    b1t = jnp.concatenate([params["b_mixpre"], params["b_pre"]], axis=0)   # (24,)
    w2t = jnp.zeros((2 * m, 24), jnp.float32)
    w2t = w2t.at[:m, :12].set(params["w_mix"])
    w2t = w2t.at[m:, 12:].set(params["w"])
    b2t = jnp.concatenate([params["b_mix"], params["b"]], axis=0)          # (2m,)
    return {
        "w1t": w1t.astype(jnp.bfloat16),
        "b1t": b1t.reshape(-1, 1).astype(jnp.float32),
        "w2t": w2t.astype(jnp.bfloat16),
        "b2t": b2t.reshape(-1, 1).astype(jnp.float32),
    }


def _pick_block_b(batch, in_size, h1, two_m):
    """Batch-tile size: as big as a conservative VMEM budget allows (multiple of 128),
    but split so large batches get >= 2 grid steps (v7x megacore)."""
    m = two_m // 2
    # Per-row VMEM estimate (bytes):
    bytes_per_row = 2 * in_size * 4          # double-buffered f32 x tile
    bytes_per_row += in_size * 2             # in-kernel bf16 copy of the x tile
    bytes_per_row += h1 * 6                  # ht f32 + its bf16 cast
    bytes_per_row += two_m * 4 * 3           # zt / exp / softmax intermediates (f32)
    bytes_per_row += 2 * (m * 2 + 4)         # double-buffered bf16 y_mix^T + f32 y^T out-tiles
    vmem_budget = 20 * 1024 * 1024           # conservative for v7x (64 MiB physical / 32 MiB scoped)
    cap = max(128, (vmem_budget // bytes_per_row) // 128 * 128)
    cap = min(cap, 32768)
    # Ensure >= 2 grid steps for large batches so dimension_semantics=("parallel",)
    # actually shards across v7x's two TensorCores (neutral on v5e/v6e).
    block_b = min(cap, _round_up(pl.cdiv(max(batch, 1), 2), 128))
    return max(block_b, 128)


@jax.jit
def classifier1_forward(x, prepared):
    """Eval-mode forward.  x: (B, inputSize) f32.  Returns (y (B,), y_mix (B, m))."""
    # TODO(synk): training-mode F.dropout(input, 0.2) not implemented (eval path only).
    B, in_size = x.shape
    two_m = prepared["w2t"].shape[0]
    m = two_m // 2
    h1 = prepared["w1t"].shape[0]

    block_b = _pick_block_b(B, in_size, h1, two_m)
    grid = (pl.cdiv(B, block_b),)   # ragged last block: reads padded, stores masked

    yt, ymixt = pl.pallas_call(
        functools.partial(classifier1_kernel, mixture=m),
        out_shape=(
            jax.ShapeDtypeStruct((1, B), jnp.float32),
            jax.ShapeDtypeStruct((m, B), jnp.bfloat16),
        ),
        grid=grid,
        in_specs=[
            pl.BlockSpec((block_b, in_size), lambda i: (i, 0)),   # x tile, pipelined (f32)
            pl.BlockSpec((h1, in_size), lambda i: (0, 0)),        # weights stay VMEM-resident
            pl.BlockSpec((h1, 1), lambda i: (0, 0)),
            pl.BlockSpec((two_m, h1), lambda i: (0, 0)),
            pl.BlockSpec((two_m, 1), lambda i: (0, 0)),
        ],
        out_specs=(
            pl.BlockSpec((1, block_b), lambda i: (0, i)),
            pl.BlockSpec((m, block_b), lambda i: (0, i)),
        ),
        compiler_params=pltpu.CompilerParams(
            dimension_semantics=("parallel",),
            vmem_limit_bytes=32 * 1024 * 1024,
        ),
    )(x, prepared["w1t"], prepared["b1t"], prepared["w2t"], prepared["b2t"])

    y = yt[0]
    # Transpose + upcast fuse into a single XLA pass over bf16 bytes (half of f32).
    y_mix = ymixt.T.astype(jnp.float32)
    return y, y_mix


def init_params(key, input_size, mixture_size):
    """kaiming_normal weights (torch defaults: gain sqrt(2), fan_in), zero biases."""
    def kaiming(k, out_f, in_f):
        std = jnp.sqrt(2.0 / in_f)
        return std * jax.random.normal(k, (out_f, in_f), dtype=jnp.float32)

    k1, k2, k3, k4 = jax.random.split(key, 4)
    return {
        "w_pre": kaiming(k1, 12, input_size),
        "b_pre": jnp.zeros((12,), jnp.float32),
        "w": kaiming(k2, mixture_size, 12),
        "b": jnp.zeros((mixture_size,), jnp.float32),
        "w_mixpre": kaiming(k3, 12, input_size),
        "b_mixpre": jnp.zeros((12,), jnp.float32),
        "w_mix": kaiming(k4, mixture_size, 12),
        "b_mix": jnp.zeros((mixture_size,), jnp.float32),
    }


def reference_forward(x, params):
    """Pure-JAX f32 reference matching the PyTorch eval-mode forward."""
    h_mix = jnp.tanh(x @ params["w_mixpre"].T + params["b_mixpre"])
    y_mix = jax.nn.softmax(h_mix @ params["w_mix"].T + params["b_mix"], axis=1)
    h = jnp.tanh(x @ params["w_pre"].T + params["b_pre"])
    y_all = h @ params["w"].T + params["b"]
    return jnp.sum(y_mix * y_all, axis=1), y_mix


if __name__ == "__main__":
    input_size = 32
    mixture_size = 8
    batch = 8

    key = jax.random.PRNGKey(0)
    kx, kp = jax.random.split(key)
    x = jax.random.normal(kx, (batch, input_size), dtype=jnp.float32)
    params = init_params(kp, input_size, mixture_size)
    prepared = prepare_params(params)   # one-time layout/fusion/bf16 prep

    y, y_mix = classifier1_forward(x, prepared)
    jax.block_until_ready((y, y_mix))

    assert y.shape == (batch,)
    assert y_mix.shape == (batch, mixture_size)
    # softmax rows sum to 1 (exact divide in-kernel; bf16 store rounding only)
    assert jnp.allclose(jnp.sum(y_mix, axis=1), 1.0, atol=1e-2)
    # match the f32 reference within bf16-matmul tolerance
    y_ref, y_mix_ref = reference_forward(x, params)
    assert jnp.allclose(y, y_ref, atol=5e-2, rtol=5e-2)
    assert jnp.allclose(y_mix, y_mix_ref, atol=5e-2, rtol=5e-2)

    print("KERNEL_OK")
</pallas_src>

<mosaic_0001>
module attributes {stable_mosaic.version = 11 : i64} {
  func.func @classifier1_kernel(%arg0: i32, %arg1: memref<128x32xf32, #tpu.memory_space<vmem>>, %arg2: memref<24x32xbf16, #tpu.memory_space<vmem>>, %arg3: memref<24x1xf32, #tpu.memory_space<vmem>>, %arg4: memref<16x24xbf16, #tpu.memory_space<vmem>>, %arg5: memref<16x1xf32, #tpu.memory_space<vmem>>, %arg6: memref<1x128xf32, #tpu.memory_space<vmem>>, %arg7: memref<8x128xbf16, #tpu.memory_space<vmem>>) attributes {dimension_semantics = [#tpu.dimension_semantics<parallel>], iteration_bounds = array<i64: 1>, scalar_prefetch = 0 : i64, scratch_operands = 0 : i64, tpu.core_type = #tpu.core_type<tc>, window_params = [{transform_indices = @transform_0, window_bounds = array<i64: 128, 32>}, {pipeline_mode = #tpu.pipeline_mode<synchronous>, transform_indices = @transform_1, window_bounds = array<i64: 24, 32>}, {pipeline_mode = #tpu.pipeline_mode<synchronous>, transform_indices = @transform_2, window_bounds = array<i64: 24, 1>}, {pipeline_mode = #tpu.pipeline_mode<synchronous>, transform_indices = @transform_3, window_bounds = array<i64: 16, 24>}, {pipeline_mode = #tpu.pipeline_mode<synchronous>, transform_indices = @transform_4, window_bounds = array<i64: 16, 1>}, {transform_indices = @transform_5, window_bounds = array<i64: 1, 128>}, {transform_indices = @transform_6, window_bounds = array<i64: 8, 128>}]} {
    %c0 = arith.constant 0 : index
    %c0_0 = arith.constant 0 : index
    %0 = vector.load %arg1[%c0, %c0_0] : memref<128x32xf32, #tpu.memory_space<vmem>>, vector<128x32xf32>
    %1 = arith.truncf %0 : vector<128x32xf32> to vector<128x32xbf16>
    %c0_1 = arith.constant 0 : index
    %c0_2 = arith.constant 0 : index
    %2 = vector.load %arg2[%c0_1, %c0_2] : memref<24x32xbf16, #tpu.memory_space<vmem>>, vector<24x32xbf16>
    %cst = arith.constant dense<0.000000e+00> : vector<24x128xf32>
    %3 = tpu.matmul %2, %1, %cst {dimension_numbers = #tpu.dot_dimension_numbers<[1], [1], [0], [0], [0, 0, 1, 0], [], []>} : vector<24x32xbf16>, vector<128x32xbf16>, vector<24x128xf32> -> vector<24x128xf32>
    %c0_3 = arith.constant 0 : index
    %c0_4 = arith.constant 0 : index
    %4 = vector.load %arg3[%c0_3, %c0_4] : memref<24x1xf32, #tpu.memory_space<vmem>>, vector<24x1xf32>
    %5 = vector.broadcast %4 : vector<24x1xf32> to vector<24x128xf32>
    %6 = arith.addf %3, %5 : vector<24x128xf32>
    %7 = math.tanh %6 : vector<24x128xf32>
    %c0_5 = arith.constant 0 : index
    %c0_6 = arith.constant 0 : index
    %8 = vector.load %arg4[%c0_5, %c0_6] : memref<16x24xbf16, #tpu.memory_space<vmem>>, vector<16x24xbf16>
    %9 = arith.truncf %7 : vector<24x128xf32> to vector<24x128xbf16>
    %cst_7 = arith.constant dense<0.000000e+00> : vector<16x128xf32>
    %10 = tpu.matmul %8, %9, %cst_7 {dimension_numbers = #tpu.dot_dimension_numbers<[1], [0], [0], [1], [0, 0, 1, 1], [], []>} : vector<16x24xbf16>, vector<24x128xbf16>, vector<16x128xf32> -> vector<16x128xf32>
    %c0_8 = arith.constant 0 : index
    %c0_9 = arith.constant 0 : index
    %11 = vector.load %arg5[%c0_8, %c0_9] : memref<16x1xf32, #tpu.memory_space<vmem>>, vector<16x1xf32>
    %12 = vector.broadcast %11 : vector<16x1xf32> to vector<16x128xf32>
    %13 = arith.addf %10, %12 : vector<16x128xf32>
    %14 = vector.extract_strided_slice %13 {offsets = [0, 0], sizes = [8, 128], strides = [1, 1]} : vector<16x128xf32> to vector<8x128xf32>
    %15 = vector.extract_strided_slice %13 {offsets = [8, 0], sizes = [8, 128], strides = [1, 1]} : vector<16x128xf32> to vector<8x128xf32>
    %cst_10 = arith.constant dense<0xFF800000> : vector<128xf32>
    %16 = vector.multi_reduction <maximumf>, %14, %cst_10 [0] : vector<8x128xf32> to vector<128xf32>
    %17 = vector.shape_cast %16 : vector<128xf32> to vector<1x128xf32>
    %18 = vector.broadcast %17 : vector<1x128xf32> to vector<8x128xf32>
    %19 = arith.subf %14, %18 : vector<8x128xf32>
    %20 = math.exp %19 : vector<8x128xf32>
    %cst_11 = arith.constant dense<0.000000e+00> : vector<128xf32>
    %21 = vector.multi_reduction <add>, %20, %cst_11 [0] : vector<8x128xf32> to vector<128xf32>
    %22 = vector.shape_cast %21 : vector<128xf32> to vector<1x128xf32>
    %23 = vector.broadcast %22 : vector<1x128xf32> to vector<8x128xf32>
    %24 = arith.divf %20, %23 : vector<8x128xf32>
    %25 = arith.mulf %24, %15 : vector<8x128xf32>
    %cst_12 = arith.constant dense<0.000000e+00> : vector<128xf32>
    %26 = vector.multi_reduction <add>, %25, %cst_12 [0] : vector<8x128xf32> to vector<128xf32>
    %27 = vector.shape_cast %26 : vector<128xf32> to vector<1x128xf32>
    %c0_13 = arith.constant 0 : index
    %c0_14 = arith.constant 0 : index
    %28 = vector.load %arg6[%c0_13, %c0_14] : memref<1x128xf32, #tpu.memory_space<vmem>>, vector<1x128xf32>
    tpu.vector_store %arg6[%c0_13, %c0_14], %27 {strides = array<i32>} : memref<1x128xf32, #tpu.memory_space<vmem>>, vector<1x128xf32>,
    %29 = arith.truncf %24 : vector<8x128xf32> to vector<8x128xbf16>
    %c0_15 = arith.constant 0 : index
    %c0_16 = arith.constant 0 : index
    %30 = vector.load %arg7[%c0_15, %c0_16] : memref<8x128xbf16, #tpu.memory_space<vmem>>, vector<8x128xbf16>
    tpu.vector_store %arg7[%c0_15, %c0_16], %29 {strides = array<i32>} : memref<8x128xbf16, #tpu.memory_space<vmem>>, vector<8x128xbf16>,
    return
  }
  func.func @transform_0(%arg0: i32) -> (i32, i32) {
    %c0_i32 = arith.constant 0 : i32
    %c0_i32_0 = arith.constant 0 : i32
    return %arg0, %c0_i32 : i32, i32
  }
  func.func @transform_1(%arg0: i32) -> (i32, i32) {
    %c0_i32 = arith.constant 0 : i32
    %c0_i32_0 = arith.constant 0 : i32
    %c0_i32_1 = arith.constant 0 : i32
    return %c0_i32, %c0_i32_0 : i32, i32
  }
  func.func @transform_2(%arg0: i32) -> (i32, i32) {
    %c0_i32 = arith.constant 0 : i32
    %c0_i32_0 = arith.constant 0 : i32
    %c0_i32_1 = arith.constant 0 : i32
    return %c0_i32, %c0_i32_0 : i32, i32
  }
  func.func @transform_3(%arg0: i32) -> (i32, i32) {
    %c0_i32 = arith.constant 0 : i32
    %c0_i32_0 = arith.constant 0 : i32
    %c0_i32_1 = arith.constant 0 : i32
    return %c0_i32, %c0_i32_0 : i32, i32
  }
  func.func @transform_4(%arg0: i32) -> (i32, i32) {
    %c0_i32 = arith.constant 0 : i32
    %c0_i32_0 = arith.constant 0 : i32
    %c0_i32_1 = arith.constant 0 : i32
    return %c0_i32, %c0_i32_0 : i32, i32
  }
  func.func @transform_5(%arg0: i32) -> (i32, i32) {
    %c0_i32 = arith.constant 0 : i32
    %c0_i32_0 = arith.constant 0 : i32
    return %c0_i32, %arg0 : i32, i32
  }
  func.func @transform_6(%arg0: i32) -> (i32, i32) {
    %c0_i32 = arith.constant 0 : i32
    %c0_i32_0 = arith.constant 0 : i32
    return %c0_i32, %arg0 : i32, i32
  }
}

</mosaic_0001>

<bundles_post_ra>
// kernel: classifier1_forward.1
= control target key start
LH: loop header
LB: loop body
LE: loop exit
PB: predicated region body
PF: predicated region fallthrough
CT: control target
= control target key end

     0   :  { %vm77_vm0 = vcmask 261120   ;;  %v372_v5 = vmov 0   ;;  %s516_s0 = inlined_call_operand.vmem [shape: f32[8,32], index: 0, kind: input, shape index: {}]   ;;  %s517_s1 = inlined_call_operand.vmem [shape: bf16[24,32], index: 1, kind: input, shape index: {}]   ;;  %s518_s2 = inlined_call_operand.vmem [shape: f32[24,1], index: 2, kind: input, shape index: {}]   ;;  %s519_s3 = inlined_call_operand.vmem [shape: bf16[16,24], index: 3, kind: input, shape index: {}]   ;;  %s520_s4 = inlined_call_operand.vmem [shape: f32[16,1], index: 4, kind: input, shape index: {}]   ;;  %s521_s5 = inlined_call_operand.hbm [shape: f32[1,8], index: 5, kind: output, shape index: {0}]   ;;  %s522_s6 = inlined_call_operand.vmem [shape: bf16[8,8], index: 6, kind: output, shape index: {1}]  }
   0x1   :  { %v24_v0 = vld [vmem:[%s516_s0] sm:$0xff]  ;;  %v25_v1 = vld [vmem:[%s516_s0 + $0x8] sm:$0xff]  ;;  %v26_v2 = vld [vmem:[%s516_s0 + $0x10] sm:$0xff]  ;;  %333 = vset.pattern.permute.xlu0 %v372_v5  ;;  %334 = vset.pattern.permute.xlu1 %v372_v5 }
   0x2   :  { %v40_v3 = vpack.c.bf16 %v25_v1, %v24_v0  ;;  %v27_v4 = vld [vmem:[%s516_s0 + $0x18] sm:$0xff]  ;;  %v28_v8 = vld [vmem:[%s516_s0 + $0x20] sm:$0xff]  ;;  %v29_v9 = vld [vmem:[%s516_s0 + $0x28] sm:$0xff] }
   0x3   :  { %v41_v6 = vpack.c.bf16 %v27_v4, %v26_v2  ;;  %v335_v10 = vld [vmem:[%s517_s1] sm:$0xff]   ;;  %v52_v12 = vld [vmem:[%s518_s2 + $0x8] sm:$0xff]  ;;  %v53_v13 = vld [vmem:[%s518_s2 + $0x10] sm:$0xff]  ;;  %v42_v15 = vpack.c.bf16 %v29_v9, %v28_v8 }
   0x4   :  { %321 = vmatprep.subr.msk.bf16.mxu0 %vm77_vm0, %v40_v3  ;;  %v85_v7 = vsel %vm77_vm0, %v40_v3, 0  ;;  %v51_v11 = vld [vmem:[%s518_s2] sm:$0xff]  ;;  %309 = vmatprep.mubr.msk.bf16.mxu0 %vm77_vm0, %v335_v10 }
   0x5   :  { %294 = vmatpush3.bf16.xpose.msra.mxu0 %v85_v7  ;;  %56 = vperm.xlu0 %333, %v51_v11   ;;  %v88_v14 = vsel %vm77_vm0, %v41_v6, 0 }
   0x6   :  { %322 = vmatprep.subr.msk.bf16.mxu0 %vm77_vm0, %v41_v6  ;;  %66 = vperm.xlu1 %334, %v53_v13  }
   0x7   :  { %12 = vsyncpa [#allocation3], 0  ;;  %v163_v16 = vld [vmem:[%s520_s4] sm:$0xff]  ;;  %v164_v17 = vld [vmem:[%s520_s4 + $0x8] sm:$0xff]  ;;  %v91_v20 = vsel %vm77_vm0, %v42_v15, 0  ;;  %v373_v40 = vmov 0.0  }
   0x8   :  { %v30_v18 = vld [vmem:[%s516_s0 + $0x30] sm:$0xff]  ;;  %v31_v19 = vld [vmem:[%s516_s0 + $0x38] sm:$0xff]  ;;  %v32_v22 = vld [vmem:[%s516_s0 + $0x40] sm:$0xff]  ;;  %313 = vmatprep.subr.bf16.mxu1 %v373_v40  ;;  %vm374_vm1 = vmmov 0   ;;  %vm184_vm2 = vcmask 1043456   ;;  %vm180_vm3 = vcmask 195584  }
   0x9   :  { %61 = vperm.xlu0 %333, %v52_v12   ;;  %v43_v21 = vpack.c.bf16 %v31_v19, %v30_v18  ;;  %v33_v23 = vld [vmem:[%s516_s0 + $0x48] sm:$0xff]  ;;  %v34_v26 = vld [vmem:[%s516_s0 + $0x50] sm:$0xff]  ;;  %v35_v27 = vld [vmem:[%s516_s0 + $0x58] sm:$0xff]  ;;  %317 = vmatprep.mubr.msk.bf16.mxu1 %vm374_vm1, %v373_v40  ;;  %s375_s18 = smov [#allocation2]  }
   0xa   :  { %167 = vperm.xlu1 %334, %v163_v16   ;;  %v44_v25 = vpack.c.bf16 %v33_v23, %v32_v22  ;;  %v45_v29 = vpack.c.bf16 %v35_v27, %v34_v26  ;;  %v36_v30 = vld [vmem:[%s516_s0 + $0x60] sm:$0xff]  ;;  %v37_v31 = vld [vmem:[%s516_s0 + $0x68] sm:$0xff]  ;;  %v38_v34 = vld [vmem:[%s516_s0 + $0x70] sm:$0xff]  ;;  %s262_s19 = sshll.u32 %s375_s18, 4  ;;  %s263_s19 = int_to_ptr.vmem [resolvable:$true] %s262_s19 }
   0xb   :  { %v94_v24 = vsel %vm77_vm0, %v43_v21, 0  ;;  %v46_v33 = vpack.c.bf16 %v37_v31, %v36_v30  ;;  %v39_v35 = vld [vmem:[%s516_s0 + $0x78] sm:$0xff]  ;;  %v336_v39 = vld [vmem:[%s517_s1 + $0x8] ss:$0 sps:$4 sm:$0xff]   ;;  %v337_v57 = vld [vmem:[%s519_s3] sm:$0xff]   ;;  %s348_s20 = scalar_lea.vmem %s263_s19, 16  ;;  %p353_p1 = scmp.lt.s32.totalorder %s263_s19, %s263_s19 }
   0xc   :  { %v97_v28 = vsel %vm77_vm0, %v44_v25, 0  ;;  %v100_v32 = vsel %vm77_vm0, %v45_v29, 0  ;;  %v47_v37 = vpack.c.bf16 %v39_v35, %v38_v34  ;;  %p349_p0 = scmp.ne.s32.totalorder %s263_s19, %s348_s20  ;;  %s352_s21 = scalar_lea.vmem %s263_s19, 32 }
   0xd   :  { %296 = vmatpush3.bf16.xpose.msra.mxu0 %v88_v14  ;;  %172 = vperm.xlu0 %333, %v164_v17   ;;  %v103_v36 = vsel %vm77_vm0, %v46_v33, 0  ;;  %p354_p2 = scmp.lt.s32.totalorder %s352_s21, %s348_s20 }
   0xe   :  { %323 = vmatprep.subr.msk.bf16.mxu0 %vm77_vm0, %v42_v15  ;;  %v106_v38 = vsel %vm77_vm0, %v47_v37, 0 }
   0xf   :  { %p355_p3 = por %p354_p2, %p353_p1 }
  0x11   :  { %p356_p4 = pnand %p355_p3, %p349_p0 }
  0x15   :  { %298 = vmatpush3.bf16.xpose.msra.mxu0 %v91_v20 }
  0x16   :  { %324 = vmatprep.subr.msk.bf16.mxu0 %vm77_vm0, %v43_v21 }
  0x1d   :  { %300 = vmatpush3.bf16.xpose.msra.mxu0 %v94_v24 }
  0x1e   :  { %325 = vmatprep.subr.msk.bf16.mxu0 %vm77_vm0, %v44_v25 }
  0x25   :  { %302 = vmatpush3.bf16.xpose.msra.mxu0 %v97_v28 }
  0x26   :  { %326 = vmatprep.subr.msk.bf16.mxu0 %vm77_vm0, %v45_v29 }
  0x2d   :  { %304 = vmatpush3.bf16.xpose.msra.mxu0 %v100_v32 }
  0x2e   :  { %327 = vmatprep.subr.msk.bf16.mxu0 %vm77_vm0, %v46_v33 }
  0x35   :  { %306 = vmatpush3.bf16.xpose.msra.mxu0 %v103_v36 }
  0x36   :  { %328 = vmatprep.subr.msk.bf16.mxu0 %vm77_vm0, %v47_v37 }
  0x3d   :  { %308 = vmatpush3.bf16.xpose.msra.mxu0 %v106_v38 }
  0x44   :  { %310 = vmatmul.mubr.msk.bf16.vlgmr.msra.gmra.mrb[0].mxu0 %vm77_vm0, %v336_v39 }
  0x84   :  { %v57_v41 = vpop.permute.xlu0 %56 }
  0x85   :  { %v67_v42 = vpop.permute.xlu1 %66 }
  0x88   :  { %v62_v48 = vpop.permute.xlu0 %61 }
  0x89   :  { %v168_v58 = vpop.permute.xlu1 %167 }
  0x8c   :  { %v173_v16 = vpop.permute.xlu0 %172 }
 0x117   :  { %v311_v43 = vpop.f32.mrb[0].mxu0 }
 0x118   :  { %v151_v44 = vadd.f32 %v311_v43, %v67_v42  ;;  %v142_v45 = vpop.f32.mrb[1].mxu0 }
 0x119   :  { %v143_v46 = vadd.f32 %v142_v45, %v57_v41  ;;  %v312_v47 = vpop.f32.mrb[2].mxu0 }
 0x11a   :  { %v145_v49 = vpop.f32.mrb[3].mxu0  ;;  %338 = vtanh.f32 %v151_v44 }
 0x11b   :  { %v146_v50 = vadd.f32 %v145_v49, %v62_v48  ;;  %340 = vtanh.f32 %v143_v46 }
 0x11d   :  { %342 = vtanh.f32 %v146_v50 }
 0x124   :  { %v339_v51 = vpop.eup %338 }
 0x125   :  { %v341_v52 = vpop.eup %340  ;;  %v162_v55 = vpack.c.bf16 %v339_v51, %v339_v51 }
 0x127   :  { %v343_v53 = vpop.eup %342  ;;  %v186_v56 = vsel %vm184_vm2, %v162_v55, 0 }
 0x128   :  { %v161_v54 = vpack.c.bf16 %v343_v53, %v341_v52 }
 0x12a   :  { %314 = vmatpush3.bf16.msra.mxu1 %v161_v54 }
 0x12b   :  { %315 = vmatprep.subr.bf16.mxu1 %v373_v40 }
 0x12e   :  { %316 = vmatpush3.bf16.msra.mxu1 %v186_v56 }
 0x131   :  { %318 = vmatmul.mubr.msk.bf16.vlgmr.msra.gmra.mrb[0].mxu1 %vm180_vm3, %v337_v57 }
 0x204   :  { %v222_v59 = vpop.f32.mrb[0].mxu1 }
 0x205   :  { %v223_v60 = vadd.f32 %v222_v59, %v168_v58  ;;  %v319_v61 = vpop.f32.mrb[1].mxu1 }
 0x206   :  { %v225_v62 = vpop.f32.mrb[2].mxu1 }
 0x207   :  { %v229_v63 = vrot.slane %v223_v60, 4  ;;  %v320_v0 = vpop.f32.mrb[3].mxu1  ;;  %v226_v17 = vadd.f32 %v225_v62, %v173_v16 }
 0x209   :  { %v230_v1 = vmax.f32 %v223_v60, %v229_v63 }
 0x20b   :  { %v231_v2 = vrot.slane %v230_v1, 2 }
 0x20d   :  { %v232_v3 = vmax.f32 %v230_v1, %v231_v2 }
 0x20f   :  { %v233_v4 = vrot.slane %v232_v3, 1 }
 0x211   :  { %v234_v5 = vmax.f32 %v232_v3, %v233_v4 }
 0x213   :  { %v235_v6 = vsub.f32 %v223_v60, %v234_v5 }
 0x215   :  { %v236_v7 = vmul.f32 1.442695, %v235_v6 }
 0x217   :  { %344 = vpow2.f32 %v236_v7 }
 0x221   :  { %v345_v8 = vpop.eup %344 }
 0x222   :  { %v238_v9 = vrot.slane %v345_v8, 4 }
 0x224   :  { %v239_v10 = vadd.f32 %v345_v8, %v238_v9 }
 0x226   :  { %v240_v11 = vrot.slane %v239_v10, 2 }
 0x228   :  { %v241_v12 = vadd.f32 %v240_v11, %v239_v10 }
 0x22a   :  { %v242_v13 = vrot.slane %v241_v12, 1 }
 0x22c   :  { %v243_v14 = vadd.f32 %v242_v13, %v241_v12 }
 0x22e   :  { %346 = vrcp.f32 %v243_v14 }
 0x238   :  { %v347_v15 = vpop.eup %346 }
 0x239   :  { %v245_v18 = vmul.f32 %v347_v15, %v345_v8 }
 0x23b   :  { %v246_v19 = vmul.f32 %v245_v18, %v226_v17  ;;  %v254_v20 = vpack.c.bf16 %v245_v18, %v245_v18 }
 0x23d   :  { %v247_v21 = vrot.slane %v246_v19, 4  ;;  %255 = vst [vmem:[%s522_s6] sm:$0xf] %v254_v20 }
 0x23f   :  { %v248_v22 = vadd.f32 %v247_v21, %v246_v19 }
 0x241   :  { %v249_v23 = vrot.slane %v248_v22, 2 }
 0x243   :  { %v250_v24 = vadd.f32 %v249_v23, %v248_v22 }
 0x245   :  { %v251_v25 = vrot.slane %v250_v24, 1 }
 0x247   :  { %v252_v26 = vadd.f32 %v251_v25, %v250_v24 }
 0x249   :  { %253 = vst [vmem:[#allocation2] sm:$0x1] %v252_v26 }
 0x24a   :  { %359 = shalt.err (!%p356_p4)
}
 0x24b   :  { %s360_s6 = scalar_lea.hbm %s521_s5, 16 }
 0x24c   :  { %p361_p5 = scmp.ne.s32.totalorder %s521_s5, %s360_s6  ;;  %p364_p6 = scmp.lt.u32.totalorder %s360_s6, %s521_s5 }
 0x24e   :  { %p366_p7 = pnand %p364_p6, %p361_p5 }
 0x250   :  { %369 = shalt.err (!%p366_p7)
}
 0x251   :  { %265 = dma.vmem_to_hbm [thread:$0]  %s263_s19, 16, %s521_s5, [#allocation3]  }
 0x252   :  { %370 = dma.done.wait [#allocation3], 16  }
 0x253   :  { %371 = vsyncadd [#allocation3], 4294967280 }
 0x254   :  { %273 = vsyncpa [#allocation3], 1 }

</bundles_post_ra>
